<compile_context>
chip_gen: v5e
topology: v5e:2x2
jax: 0.10.0
libtpu: 0.0.40
codegen_flags: <defaults>
</compile_context>

<pallas_src>
import jax
import jax.numpy as jnp
from jax.experimental import pallas as pl
from jax.experimental.pallas import tpu as pltpu

# ---- model hyper-params (small, consistent with the module) ------------------
BATCH = 2
DIM = 32
NUM_HEADS = 4
HEAD_DIM = DIM // NUM_HEADS
FFN_DIM = 64
NUM_MODALITIES = 3

MXU_DTYPE = jnp.bfloat16      # MXU-native on v5e/v6e/v7x; accumulation stays f32
MAX_TB = 1024                 # batch-tile cap (blocks are KiB-scale vs 64+ MiB VMEM)
NEG_PAD = -1e30               # logit padding for lanes 3..127 of the output head

# ---- packed parameter-slab layout (ONE f32 (P_ROWS, P_COLS) array, 1 DMA) -----
P_COLS = 128
R_WQ  = 0                      # rows [  0, 64): [Wq ; Wg@Wq]          (2D, D)
R_WKV = R_WQ + 2 * DIM         # rows [ 64, 96): [Wk | Wv]             (D, 2D)
R_W1  = R_WKV + DIM            # rows [ 96,128): ffn W1                (D, F)
R_W2  = R_W1 + DIM             # rows [128,192): ffn W2                (F, D)
R_WP  = R_W2 + FFN_DIM         # rows [192,224): weight_proj, lane-dense (D, 128)
R_MDH = R_WP + DIM             # rows [224,256): head mask dim->head   (D, H)
R_MHD = R_MDH + DIM            # rows [256,260): head mask head->dim   (H, D)
R_VEC = R_MHD + NUM_HEADS      # rows [260,269): one bias / LN vector per row
V_BQ, V_BKV, V_G1, V_BE1, V_BF1, V_BF2, V_G2, V_BE2, V_BP = range(9)
P_ROWS = ((R_VEC + 9 + 7) // 8) * 8   # 272, sublane-aligned


def _round_up(x, m):
    return ((x + m - 1) // m) * m


def _layer_norm(x, gamma, beta, eps=1e-5):
    mu = jnp.mean(x, axis=-1, keepdims=True)
    xc = x - mu
    var = jnp.mean(xc * xc, axis=-1, keepdims=True)
    return xc * jax.lax.rsqrt(var + eps) * gamma + beta


# ---- the Pallas kernel --------------------------------------------------------
def dat_kernel(mods_ref, dom_ref, p_ref, out_ref):
    f32 = jnp.float32
    mxu = MXU_DTYPE
    D, H, Dh, F, M = DIM, NUM_HEADS, HEAD_DIM, FFN_DIM, NUM_MODALITIES
    TB = dom_ref.shape[0]

    # ---- carve the packed parameter slab (static slices of the single DMA'd input)
    wq  = p_ref[R_WQ:R_WQ + 2 * D, 0:D].astype(mxu)          # (2D, D) = [Wq ; Wg@Wq]
    wkv = p_ref[R_WKV:R_WKV + D, 0:2 * D].astype(mxu)        # (D, 2D) = [Wk | Wv]
    w1  = p_ref[R_W1:R_W1 + D, 0:F].astype(mxu)              # (D, F)
    w2  = p_ref[R_W2:R_W2 + F, 0:D].astype(mxu)              # (F, D)
    wp  = p_ref[R_WP:R_WP + D, 0:P_COLS].astype(mxu)         # (D, 128) lane-dense
    mdh = p_ref[R_MDH:R_MDH + D, 0:H].astype(mxu)            # (D, H) head mask
    mhd = p_ref[R_MHD:R_MHD + H, 0:D].astype(mxu)            # (H, D) head mask
    bq  = p_ref[R_VEC + V_BQ:R_VEC + V_BQ + 1, 0:D]          # (1, D) = bg@Wq + bq
    bkv = p_ref[R_VEC + V_BKV:R_VEC + V_BKV + 1, 0:2 * D]    # (1, 2D) = [bk | bv]
    g1  = p_ref[R_VEC + V_G1:R_VEC + V_G1 + 1, 0:D]
    be1 = p_ref[R_VEC + V_BE1:R_VEC + V_BE1 + 1, 0:D]
    bf1 = p_ref[R_VEC + V_BF1:R_VEC + V_BF1 + 1, 0:F]
    bf2 = p_ref[R_VEC + V_BF2:R_VEC + V_BF2 + 1, 0:D]
    g2  = p_ref[R_VEC + V_G2:R_VEC + V_G2 + 1, 0:D]
    be2 = p_ref[R_VEC + V_BE2:R_VEC + V_BE2 + 1, 0:D]
    bp  = p_ref[R_VEC + V_BP:R_VEC + V_BP + 1, 0:P_COLS]     # (1,128), -1e30 in pad lanes

    dom = dom_ref[...]                                       # (TB, D) f32
    m0, m1, m2 = mods_ref[0], mods_ref[1], mods_ref[2]       # each (TB, D) f32
    gmean = (m0 + m1 + m2) * (1.0 / M)

    # fused q projection (global_proj folded into q_proj):
    #   q = dom@Wq + gmean@(Wg@Wq) + (bg@Wq + bq)
    dg = jnp.concatenate([dom, gmean], axis=1).astype(mxu)   # (TB, 2D)
    q = jnp.dot(dg, wq, preferred_element_type=f32) + bq     # (TB, D) f32

    # fused K/V projection for all 3 modalities: one (3TB,D)x(D,2D) matmul
    m_all = jnp.concatenate([m0, m1, m2], axis=0).astype(mxu)            # (3TB, D)
    kv = jnp.dot(m_all, wkv, preferred_element_type=f32) + bkv           # (3TB, 2D)
    k_all = kv[:, 0:D]
    v_all = kv[:, D:2 * D]

    # per-head scores via the head-membership mask matmul (masks come from the slab)
    scale = 1.0 / (float(Dh) ** 0.5)
    qk = jnp.concatenate([q * k_all[0:TB],                                # tile-aligned
                          q * k_all[TB:2 * TB],
                          q * k_all[2 * TB:3 * TB]], axis=0).astype(mxu)  # (3TB, D)
    scores = jnp.dot(qk, mdh, preferred_element_type=f32) * scale         # (3TB, H)

    # softmax over the 3 modalities (per batch row and head) — approx recip is fine here
    s0, s1, s2 = scores[0:TB], scores[TB:2 * TB], scores[2 * TB:3 * TB]
    smax = jnp.maximum(jnp.maximum(s0, s1), s2)
    e0, e1, e2 = jnp.exp(s0 - smax), jnp.exp(s1 - smax), jnp.exp(s2 - smax)
    inv = pl.reciprocal(e0 + e1 + e2, approx=True)                        # EUP slot
    attn = jnp.concatenate([e0 * inv, e1 * inv, e2 * inv], axis=0).astype(mxu)  # (3TB, H)

    # broadcast attn back to feature lanes (one matmul), apply V, reduce over modalities
    ctx = jnp.dot(attn, mhd, preferred_element_type=f32) * v_all          # (3TB, D)
    att_out = ctx[0:TB] + ctx[TB:2 * TB] + ctx[2 * TB:3 * TB]             # (TB, D)

    # residual + LayerNorm 1 (dropout = identity in eval mode) — f32 elementwise
    x = _layer_norm(dom + att_out, g1, be1)

    # FFN: Linear -> ReLU -> Linear, residual, LayerNorm 2
    h = jnp.maximum(jnp.dot(x.astype(mxu), w1, preferred_element_type=f32) + bf1, 0.0)
    y = jnp.dot(h.astype(mxu), w2, preferred_element_type=f32) + bf2
    x = _layer_norm(x + y, g2, be2)

    # modality weights: lane-dense (TB,128) logits; pad lanes carry -1e30 -> exp()==0,
    # so the full-lane softmax equals softmax over the 3 real logits.
    logits = jnp.dot(x.astype(mxu), wp, preferred_element_type=f32) + bp  # (TB, 128)
    lmax = jnp.max(logits, axis=-1, keepdims=True)
    e = jnp.exp(logits - lmax)
    out_ref[...] = e / jnp.sum(e, axis=-1, keepdims=True)   # exact normalize (final output)


# ---- wrapper ------------------------------------------------------------------
def domain_aware_transformer(mods, dom, packed_params):
    B, D = dom.shape
    assert D == DIM and mods.shape == (NUM_MODALITIES, B, D)

    B8 = _round_up(B, 8)                 # sublane-aligned batch
    TB = min(B8, MAX_TB)                 # big tiles amortize the ~0.35us/step overhead
    if B8 > 8 and B8 // TB < 2:
        # v7x megacore: keep >= 2 grid steps once the batch is big enough so the
        # "parallel" axis shards across both TensorCores.
        TB = _round_up(pl.cdiv(B8, 2), 8)
    B_pad = _round_up(B8, TB)

    if B_pad != B:
        mods = jnp.pad(mods, ((0, 0), (0, B_pad - B), (0, 0)))
        dom = jnp.pad(dom, ((0, B_pad - B), (0, 0)))

    out = pl.pallas_call(
        dat_kernel,
        out_shape=jax.ShapeDtypeStruct((B_pad, P_COLS), jnp.float32),
        grid=(B_pad // TB,),
        in_specs=[
            pl.BlockSpec((NUM_MODALITIES, TB, D), lambda i: (0, i, 0)),
            pl.BlockSpec((TB, D), lambda i: (i, 0)),
            pl.BlockSpec((P_ROWS, P_COLS), lambda i: (0, 0)),   # constant block -> 1 DMA
        ],
        out_specs=pl.BlockSpec((TB, P_COLS), lambda i: (i, 0)),  # lane-dense writeback
        compiler_params=pltpu.CompilerParams(
            dimension_semantics=("parallel",)),
    )(mods, dom, packed_params)
    return out[:B, :NUM_MODALITIES]


# ---- host-side parameter packing (done once; 1 DMA into the kernel) -----------
def pack_params(raw):
    (wg, bg, wq, bq, wk, bk, wv, bv,
     g1, be1, w1, bf1, w2, bf2, g2, be2, wp, bp) = raw

    wq_stack = jnp.concatenate([wq, wg @ wq], axis=0)        # (2D, D)
    bq_fused = bg @ wq + bq                                  # (1, D)
    wkv = jnp.concatenate([wk, wv], axis=1)                  # (D, 2D)
    bkv = jnp.concatenate([bk, bv], axis=1)                  # (1, 2D)

    wp_wide = jnp.zeros((DIM, P_COLS), jnp.float32).at[:, :NUM_MODALITIES].set(wp)
    bp_wide = jnp.full((1, P_COLS), NEG_PAD, jnp.float32).at[:, :NUM_MODALITIES].set(bp)

    # head-membership masks (compile-time constants; ride the parameter DMA)
    hmask_dh = (jnp.arange(DIM)[:, None] // HEAD_DIM ==
                jnp.arange(NUM_HEADS)[None, :]).astype(jnp.float32)       # (D, H)
    hmask_hd = hmask_dh.T                                                 # (H, D)

    slab = jnp.zeros((P_ROWS, P_COLS), jnp.float32)
    slab = slab.at[R_WQ:R_WQ + 2 * DIM, 0:DIM].set(wq_stack)
    slab = slab.at[R_WKV:R_WKV + DIM, 0:2 * DIM].set(wkv)
    slab = slab.at[R_W1:R_W1 + DIM, 0:FFN_DIM].set(w1)
    slab = slab.at[R_W2:R_W2 + FFN_DIM, 0:DIM].set(w2)
    slab = slab.at[R_WP:R_WP + DIM, :].set(wp_wide)
    slab = slab.at[R_MDH:R_MDH + DIM, 0:NUM_HEADS].set(hmask_dh)
    slab = slab.at[R_MHD:R_MHD + NUM_HEADS, 0:DIM].set(hmask_hd)
    for off, v in ((V_BQ, bq_fused), (V_BKV, bkv), (V_G1, g1), (V_BE1, be1),
                   (V_BF1, bf1), (V_BF2, bf2), (V_G2, g2), (V_BE2, be2), (V_BP, bp_wide)):
        slab = slab.at[R_VEC + off, 0:v.shape[-1]].set(v[0])
    return slab


# ---- pure-JAX reference (mirrors the PyTorch forward, f32 everywhere) ----------
def reference(mods, dom, raw):
    (wg, bg, wq, bq, wk, bk, wv, bv,
     g1, be1, w1, bf1, w2, bf2, g2, be2, wp, bp) = raw
    B, D = dom.shape
    H, Dh = NUM_HEADS, HEAD_DIM
    gmean = jnp.mean(mods, axis=0)
    grep = gmean @ wg + bg
    q = ((dom + grep) @ wq + bq).reshape(B, H, Dh)
    k = (jnp.einsum('mbd,de->mbe', mods, wk) + bk).reshape(NUM_MODALITIES, B, H, Dh)
    v = (jnp.einsum('mbd,de->mbe', mods, wv) + bv).reshape(NUM_MODALITIES, B, H, Dh)
    scores = jnp.einsum('bhd,mbhd->bhm', q, k) / (Dh ** 0.5)
    attn = jax.nn.softmax(scores, axis=-1)
    out = jnp.einsum('bhm,mbhd->bhd', attn, v).reshape(B, D)
    x = _layer_norm(dom + out, g1, be1)
    y = jnp.maximum(x @ w1 + bf1, 0.0) @ w2 + bf2
    x = _layer_norm(x + y, g2, be2)
    return jax.nn.softmax(x @ wp + bp, axis=-1)


# ---- deterministic parameter init ----------------------------------------------
def make_params(key):
    def linear(k, fin, fout):
        k1, k2 = jax.random.split(k)
        w = 0.05 * jax.random.normal(k1, (fin, fout), jnp.float32)
        b = 0.05 * jax.random.normal(k2, (1, fout), jnp.float32)
        return w, b

    keys = jax.random.split(key, 7)
    wg, bg = linear(keys[0], DIM, DIM)              # global_proj
    wq, bq = linear(keys[1], DIM, DIM)              # q_proj
    wk, bk = linear(keys[2], DIM, DIM)              # k_proj
    wv, bv = linear(keys[3], DIM, DIM)              # v_proj
    w1, bf1 = linear(keys[4], DIM, FFN_DIM)         # ffn[0]
    w2, bf2 = linear(keys[5], FFN_DIM, DIM)         # ffn[2]
    wp, bp = linear(keys[6], DIM, NUM_MODALITIES)   # weight_proj

    g1 = jnp.ones((1, DIM), jnp.float32)
    be1 = jnp.zeros((1, DIM), jnp.float32)
    g2 = jnp.ones((1, DIM), jnp.float32)
    be2 = jnp.zeros((1, DIM), jnp.float32)
    return (wg, bg, wq, bq, wk, bk, wv, bv,
            g1, be1, w1, bf1, w2, bf2, g2, be2, wp, bp)


if __name__ == "__main__":
    key = jax.random.PRNGKey(0)
    k_param, k_mods, k_dom = jax.random.split(key, 3)
    raw = make_params(k_param)
    packed = pack_params(raw)

    mods = jax.random.normal(k_mods, (NUM_MODALITIES, BATCH, DIM), jnp.float32)
    dom = jax.random.normal(k_dom, (BATCH, DIM), jnp.float32)

    out = jax.block_until_ready(domain_aware_transformer(mods, dom, packed))
    ref = jax.block_until_ready(reference(mods, dom, raw))

    assert out.shape == (BATCH, NUM_MODALITIES)
    # Tolerance reflects bf16 MXU operands (f32 accumulation); elementwise math is f32.
    assert jnp.allclose(out, ref, rtol=1e-2, atol=1e-2), (out, ref)
    # TODO(synk): o_proj exists in __init__ but is unused in forward(); dropout is identity (eval).
    print("KERNEL_OK")
</pallas_src>

<mosaic_0001>
module attributes {stable_mosaic.version = 11 : i64} {
  func.func @dat_kernel(%arg0: i32, %arg1: memref<3x8x32xf32, #tpu.memory_space<vmem>>, %arg2: memref<8x32xf32, #tpu.memory_space<vmem>>, %arg3: memref<272x128xf32, #tpu.memory_space<vmem>>, %arg4: memref<8x128xf32, #tpu.memory_space<vmem>>) attributes {dimension_semantics = [#tpu.dimension_semantics<parallel>], iteration_bounds = array<i64: 1>, scalar_prefetch = 0 : i64, scratch_operands = 0 : i64, tpu.core_type = #tpu.core_type<tc>, window_params = [{transform_indices = @transform_0, window_bounds = array<i64: 3, 8, 32>}, {transform_indices = @transform_1, window_bounds = array<i64: 8, 32>}, {pipeline_mode = #tpu.pipeline_mode<synchronous>, transform_indices = @transform_2, window_bounds = array<i64: 272, 128>}, {transform_indices = @transform_3, window_bounds = array<i64: 8, 128>}]} {
    %c0 = arith.constant 0 : index
    %c0_0 = arith.constant 0 : index
    %0 = vector.load %arg3[%c0, %c0_0] : memref<272x128xf32, #tpu.memory_space<vmem>>, vector<64x32xf32>
    %1 = arith.truncf %0 : vector<64x32xf32> to vector<64x32xbf16>
    %c64 = arith.constant 64 : index
    %c0_1 = arith.constant 0 : index
    %2 = vector.load %arg3[%c64, %c0_1] : memref<272x128xf32, #tpu.memory_space<vmem>>, vector<32x64xf32>
    %3 = arith.truncf %2 : vector<32x64xf32> to vector<32x64xbf16>
    %c96 = arith.constant 96 : index
    %c0_2 = arith.constant 0 : index
    %4 = vector.load %arg3[%c96, %c0_2] : memref<272x128xf32, #tpu.memory_space<vmem>>, vector<32x64xf32>
    %5 = arith.truncf %4 : vector<32x64xf32> to vector<32x64xbf16>
    %c128 = arith.constant 128 : index
    %c0_3 = arith.constant 0 : index
    %6 = vector.load %arg3[%c128, %c0_3] : memref<272x128xf32, #tpu.memory_space<vmem>>, vector<64x32xf32>
    %7 = arith.truncf %6 : vector<64x32xf32> to vector<64x32xbf16>
    %c192 = arith.constant 192 : index
    %c0_4 = arith.constant 0 : index
    %8 = vector.load %arg3[%c192, %c0_4] : memref<272x128xf32, #tpu.memory_space<vmem>>, vector<32x128xf32>
    %9 = arith.truncf %8 : vector<32x128xf32> to vector<32x128xbf16>
    %c224 = arith.constant 224 : index
    %c0_5 = arith.constant 0 : index
    %10 = vector.load %arg3[%c224, %c0_5] : memref<272x128xf32, #tpu.memory_space<vmem>>, vector<32x4xf32>
    %11 = arith.truncf %10 : vector<32x4xf32> to vector<32x4xbf16>
    %c256 = arith.constant 256 : index
    %c0_6 = arith.constant 0 : index
    %12 = vector.load %arg3[%c256, %c0_6] : memref<272x128xf32, #tpu.memory_space<vmem>>, vector<4x32xf32>
    %13 = arith.truncf %12 : vector<4x32xf32> to vector<4x32xbf16>
    %c260 = arith.constant 260 : index
    %c0_7 = arith.constant 0 : index
    %14 = vector.load %arg3[%c260, %c0_7] : memref<272x128xf32, #tpu.memory_space<vmem>>, vector<1x32xf32>
    %c261 = arith.constant 261 : index
    %c0_8 = arith.constant 0 : index
    %15 = vector.load %arg3[%c261, %c0_8] : memref<272x128xf32, #tpu.memory_space<vmem>>, vector<1x64xf32>
    %c262 = arith.constant 262 : index
    %c0_9 = arith.constant 0 : index
    %16 = vector.load %arg3[%c262, %c0_9] : memref<272x128xf32, #tpu.memory_space<vmem>>, vector<1x32xf32>
    %c263 = arith.constant 263 : index
    %c0_10 = arith.constant 0 : index
    %17 = vector.load %arg3[%c263, %c0_10] : memref<272x128xf32, #tpu.memory_space<vmem>>, vector<1x32xf32>
    %c264 = arith.constant 264 : index
    %c0_11 = arith.constant 0 : index
    %18 = vector.load %arg3[%c264, %c0_11] : memref<272x128xf32, #tpu.memory_space<vmem>>, vector<1x64xf32>
    %c265 = arith.constant 265 : index
    %c0_12 = arith.constant 0 : index
    %19 = vector.load %arg3[%c265, %c0_12] : memref<272x128xf32, #tpu.memory_space<vmem>>, vector<1x32xf32>
    %c266 = arith.constant 266 : index
    %c0_13 = arith.constant 0 : index
    %20 = vector.load %arg3[%c266, %c0_13] : memref<272x128xf32, #tpu.memory_space<vmem>>, vector<1x32xf32>
    %c267 = arith.constant 267 : index
    %c0_14 = arith.constant 0 : index
    %21 = vector.load %arg3[%c267, %c0_14] : memref<272x128xf32, #tpu.memory_space<vmem>>, vector<1x32xf32>
    %c268 = arith.constant 268 : index
    %c0_15 = arith.constant 0 : index
    %22 = vector.load %arg3[%c268, %c0_15] : memref<272x128xf32, #tpu.memory_space<vmem>>, vector<1x128xf32>
    %c0_16 = arith.constant 0 : index
    %c0_17 = arith.constant 0 : index
    %23 = vector.load %arg2[%c0_16, %c0_17] : memref<8x32xf32, #tpu.memory_space<vmem>>, vector<8x32xf32>
    %c0_18 = arith.constant 0 : index
    %c0_19 = arith.constant 0 : index
    %c0_20 = arith.constant 0 : index
    %24 = vector.load %arg1[%c0_18, %c0_19, %c0_20] : memref<3x8x32xf32, #tpu.memory_space<vmem>>, vector<1x8x32xf32>
    %25 = vector.shape_cast %24 : vector<1x8x32xf32> to vector<8x32xf32>
    %c1 = arith.constant 1 : index
    %c0_21 = arith.constant 0 : index
    %c0_22 = arith.constant 0 : index
    %26 = vector.load %arg1[%c1, %c0_21, %c0_22] : memref<3x8x32xf32, #tpu.memory_space<vmem>>, vector<1x8x32xf32>
    %27 = vector.shape_cast %26 : vector<1x8x32xf32> to vector<8x32xf32>
    %c2 = arith.constant 2 : index
    %c0_23 = arith.constant 0 : index
    %c0_24 = arith.constant 0 : index
    %28 = vector.load %arg1[%c2, %c0_23, %c0_24] : memref<3x8x32xf32, #tpu.memory_space<vmem>>, vector<1x8x32xf32>
    %29 = vector.shape_cast %28 : vector<1x8x32xf32> to vector<8x32xf32>
    %30 = arith.addf %25, %27 : vector<8x32xf32>
    %31 = arith.addf %30, %29 : vector<8x32xf32>
    %cst = arith.constant 0.333333343 : f32
    %32 = vector.broadcast %cst : f32 to vector<8x32xf32>
    %33 = arith.mulf %31, %32 : vector<8x32xf32>
    %34 = tpu.concatenate %23, %33 in 1 : vector<8x32xf32>, vector<8x32xf32> -> vector<8x64xf32>
    %35 = arith.truncf %34 : vector<8x64xf32> to vector<8x64xbf16>
    %cst_25 = arith.constant dense<0.000000e+00> : vector<8x32xf32>
    %36 = tpu.matmul %35, %1, %cst_25 {dimension_numbers = #tpu.dot_dimension_numbers<[1], [0], [0], [1], [0, 0, 1, 1], [], []>} : vector<8x64xbf16>, vector<64x32xbf16>, vector<8x32xf32> -> vector<8x32xf32>
    %37 = vector.broadcast %14 : vector<1x32xf32> to vector<8x32xf32>
    %38 = arith.addf %36, %37 : vector<8x32xf32>
    %39 = tpu.concatenate %25, %27, %29 in 0 : vector<8x32xf32>, vector<8x32xf32>, vector<8x32xf32> -> vector<24x32xf32>
    %40 = arith.truncf %39 : vector<24x32xf32> to vector<24x32xbf16>
    %cst_26 = arith.constant dense<0.000000e+00> : vector<24x64xf32>
    %41 = tpu.matmul %40, %3, %cst_26 {dimension_numbers = #tpu.dot_dimension_numbers<[1], [0], [0], [1], [0, 0, 1, 1], [], []>} : vector<24x32xbf16>, vector<32x64xbf16>, vector<24x64xf32> -> vector<24x64xf32>
    %42 = vector.broadcast %15 : vector<1x64xf32> to vector<24x64xf32>
    %43 = arith.addf %41, %42 : vector<24x64xf32>
    %44 = vector.extract_strided_slice %43 {offsets = [0, 0], sizes = [24, 32], strides = [1, 1]} : vector<24x64xf32> to vector<24x32xf32>
    %45 = vector.extract_strided_slice %43 {offsets = [0, 32], sizes = [24, 32], strides = [1, 1]} : vector<24x64xf32> to vector<24x32xf32>
    %46 = vector.extract_strided_slice %44 {offsets = [0, 0], sizes = [8, 32], strides = [1, 1]} : vector<24x32xf32> to vector<8x32xf32>
    %47 = arith.mulf %38, %46 : vector<8x32xf32>
    %48 = vector.extract_strided_slice %44 {offsets = [8, 0], sizes = [8, 32], strides = [1, 1]} : vector<24x32xf32> to vector<8x32xf32>
    %49 = arith.mulf %38, %48 : vector<8x32xf32>
    %50 = vector.extract_strided_slice %44 {offsets = [16, 0], sizes = [8, 32], strides = [1, 1]} : vector<24x32xf32> to vector<8x32xf32>
    %51 = arith.mulf %38, %50 : vector<8x32xf32>
    %52 = tpu.concatenate %47, %49, %51 in 0 : vector<8x32xf32>, vector<8x32xf32>, vector<8x32xf32> -> vector<24x32xf32>
    %53 = arith.truncf %52 : vector<24x32xf32> to vector<24x32xbf16>
    %cst_27 = arith.constant dense<0.000000e+00> : vector<24x4xf32>
    %54 = tpu.matmul %53, %11, %cst_27 {dimension_numbers = #tpu.dot_dimension_numbers<[1], [0], [0], [1], [0, 0, 1, 1], [], []>} : vector<24x32xbf16>, vector<32x4xbf16>, vector<24x4xf32> -> vector<24x4xf32>
    %cst_28 = arith.constant 0.353553385 : f32
    %55 = vector.broadcast %cst_28 : f32 to vector<24x4xf32>
    %56 = arith.mulf %54, %55 : vector<24x4xf32>
    %57 = vector.extract_strided_slice %56 {offsets = [0, 0], sizes = [8, 4], strides = [1, 1]} : vector<24x4xf32> to vector<8x4xf32>
    %58 = vector.extract_strided_slice %56 {offsets = [8, 0], sizes = [8, 4], strides = [1, 1]} : vector<24x4xf32> to vector<8x4xf32>
    %59 = vector.extract_strided_slice %56 {offsets = [16, 0], sizes = [8, 4], strides = [1, 1]} : vector<24x4xf32> to vector<8x4xf32>
    %60 = arith.maximumf %57, %58 : vector<8x4xf32>
    %61 = arith.maximumf %60, %59 : vector<8x4xf32>
    %62 = arith.subf %57, %61 : vector<8x4xf32>
    %63 = math.exp %62 : vector<8x4xf32>
    %64 = arith.subf %58, %61 : vector<8x4xf32>
    %65 = math.exp %64 : vector<8x4xf32>
    %66 = arith.subf %59, %61 : vector<8x4xf32>
    %67 = math.exp %66 : vector<8x4xf32>
    %68 = arith.addf %63, %65 : vector<8x4xf32>
    %69 = arith.addf %68, %67 : vector<8x4xf32>
    %70 = tpu.reciprocal %69 {approx = true} : vector<8x4xf32> -> vector<8x4xf32>
    %71 = arith.mulf %63, %70 : vector<8x4xf32>
    %72 = arith.mulf %65, %70 : vector<8x4xf32>
    %73 = arith.mulf %67, %70 : vector<8x4xf32>
    %74 = tpu.concatenate %71, %72, %73 in 0 : vector<8x4xf32>, vector<8x4xf32>, vector<8x4xf32> -> vector<24x4xf32>
    %75 = arith.truncf %74 : vector<24x4xf32> to vector<24x4xbf16>
    %cst_29 = arith.constant dense<0.000000e+00> : vector<24x32xf32>
    %76 = tpu.matmul %75, %13, %cst_29 {dimension_numbers = #tpu.dot_dimension_numbers<[1], [0], [0], [1], [0, 0, 1, 1], [], []>} : vector<24x4xbf16>, vector<4x32xbf16>, vector<24x32xf32> -> vector<24x32xf32>
    %77 = arith.mulf %76, %45 : vector<24x32xf32>
    %78 = vector.extract_strided_slice %77 {offsets = [0, 0], sizes = [8, 32], strides = [1, 1]} : vector<24x32xf32> to vector<8x32xf32>
    %79 = vector.extract_strided_slice %77 {offsets = [8, 0], sizes = [8, 32], strides = [1, 1]} : vector<24x32xf32> to vector<8x32xf32>
    %80 = arith.addf %78, %79 : vector<8x32xf32>
    %81 = vector.extract_strided_slice %77 {offsets = [16, 0], sizes = [8, 32], strides = [1, 1]} : vector<24x32xf32> to vector<8x32xf32>
    %82 = arith.addf %80, %81 : vector<8x32xf32>
    %83 = arith.addf %23, %82 : vector<8x32xf32>
    %cst_30 = arith.constant dense<0.000000e+00> : vector<8xf32>
    %84 = vector.multi_reduction <add>, %83, %cst_30 [1] : vector<8x32xf32> to vector<8xf32>
    %85 = vector.shape_cast %84 : vector<8xf32> to vector<8x1xf32>
    %cst_31 = arith.constant 3.200000e+01 : f32
    %86 = vector.broadcast %cst_31 : f32 to vector<8x1xf32>
    %87 = arith.divf %85, %86 : vector<8x1xf32>
    %88 = vector.broadcast %87 : vector<8x1xf32> to vector<8x32xf32>
    %89 = arith.subf %83, %88 : vector<8x32xf32>
    %90 = arith.mulf %89, %89 : vector<8x32xf32>
    %cst_32 = arith.constant dense<0.000000e+00> : vector<8xf32>
    %91 = vector.multi_reduction <add>, %90, %cst_32 [1] : vector<8x32xf32> to vector<8xf32>
    %92 = vector.shape_cast %91 : vector<8xf32> to vector<8x1xf32>
    %cst_33 = arith.constant 3.200000e+01 : f32
    %93 = vector.broadcast %cst_33 : f32 to vector<8x1xf32>
    %94 = arith.divf %92, %93 : vector<8x1xf32>
    %cst_34 = arith.constant 9.99999974E-6 : f32
    %95 = vector.broadcast %cst_34 : f32 to vector<8x1xf32>
    %96 = arith.addf %94, %95 : vector<8x1xf32>
    %97 = math.rsqrt %96 : vector<8x1xf32>
    %98 = vector.broadcast %97 : vector<8x1xf32> to vector<8x32xf32>
    %99 = arith.mulf %89, %98 : vector<8x32xf32>
    %100 = vector.broadcast %16 : vector<1x32xf32> to vector<8x32xf32>
    %101 = arith.mulf %99, %100 : vector<8x32xf32>
    %102 = vector.broadcast %17 : vector<1x32xf32> to vector<8x32xf32>
    %103 = arith.addf %101, %102 : vector<8x32xf32>
    %104 = arith.truncf %103 : vector<8x32xf32> to vector<8x32xbf16>
    %cst_35 = arith.constant dense<0.000000e+00> : vector<8x64xf32>
    %105 = tpu.matmul %104, %5, %cst_35 {dimension_numbers = #tpu.dot_dimension_numbers<[1], [0], [0], [1], [0, 0, 1, 1], [], []>} : vector<8x32xbf16>, vector<32x64xbf16>, vector<8x64xf32> -> vector<8x64xf32>
    %106 = vector.broadcast %18 : vector<1x64xf32> to vector<8x64xf32>
    %107 = arith.addf %105, %106 : vector<8x64xf32>
    %cst_36 = arith.constant 0.000000e+00 : f32
    %108 = vector.broadcast %cst_36 : f32 to vector<8x64xf32>
    %109 = arith.maximumf %107, %108 : vector<8x64xf32>
    %110 = arith.truncf %109 : vector<8x64xf32> to vector<8x64xbf16>
    %cst_37 = arith.constant dense<0.000000e+00> : vector<8x32xf32>
    %111 = tpu.matmul %110, %7, %cst_37 {dimension_numbers = #tpu.dot_dimension_numbers<[1], [0], [0], [1], [0, 0, 1, 1], [], []>} : vector<8x64xbf16>, vector<64x32xbf16>, vector<8x32xf32> -> vector<8x32xf32>
    %112 = vector.broadcast %19 : vector<1x32xf32> to vector<8x32xf32>
    %113 = arith.addf %111, %112 : vector<8x32xf32>
    %114 = arith.addf %103, %113 : vector<8x32xf32>
    %cst_38 = arith.constant dense<0.000000e+00> : vector<8xf32>
    %115 = vector.multi_reduction <add>, %114, %cst_38 [1] : vector<8x32xf32> to vector<8xf32>
    %116 = vector.shape_cast %115 : vector<8xf32> to vector<8x1xf32>
    %cst_39 = arith.constant 3.200000e+01 : f32
    %117 = vector.broadcast %cst_39 : f32 to vector<8x1xf32>
    %118 = arith.divf %116, %117 : vector<8x1xf32>
    %119 = vector.broadcast %118 : vector<8x1xf32> to vector<8x32xf32>
    %120 = arith.subf %114, %119 : vector<8x32xf32>
    %121 = arith.mulf %120, %120 : vector<8x32xf32>
    %cst_40 = arith.constant dense<0.000000e+00> : vector<8xf32>
    %122 = vector.multi_reduction <add>, %121, %cst_40 [1] : vector<8x32xf32> to vector<8xf32>
    %123 = vector.shape_cast %122 : vector<8xf32> to vector<8x1xf32>
    %cst_41 = arith.constant 3.200000e+01 : f32
    %124 = vector.broadcast %cst_41 : f32 to vector<8x1xf32>
    %125 = arith.divf %123, %124 : vector<8x1xf32>
    %cst_42 = arith.constant 9.99999974E-6 : f32
    %126 = vector.broadcast %cst_42 : f32 to vector<8x1xf32>
    %127 = arith.addf %125, %126 : vector<8x1xf32>
    %128 = math.rsqrt %127 : vector<8x1xf32>
    %129 = vector.broadcast %128 : vector<8x1xf32> to vector<8x32xf32>
    %130 = arith.mulf %120, %129 : vector<8x32xf32>
    %131 = vector.broadcast %20 : vector<1x32xf32> to vector<8x32xf32>
    %132 = arith.mulf %130, %131 : vector<8x32xf32>
    %133 = vector.broadcast %21 : vector<1x32xf32> to vector<8x32xf32>
    %134 = arith.addf %132, %133 : vector<8x32xf32>
    %135 = arith.truncf %134 : vector<8x32xf32> to vector<8x32xbf16>
    %cst_43 = arith.constant dense<0.000000e+00> : vector<8x128xf32>
    %136 = tpu.matmul %135, %9, %cst_43 {dimension_numbers = #tpu.dot_dimension_numbers<[1], [0], [0], [1], [0, 0, 1, 1], [], []>} : vector<8x32xbf16>, vector<32x128xbf16>, vector<8x128xf32> -> vector<8x128xf32>
    %137 = vector.broadcast %22 : vector<1x128xf32> to vector<8x128xf32>
    %138 = arith.addf %136, %137 : vector<8x128xf32>
    %cst_44 = arith.constant dense<0xFF800000> : vector<8xf32>
    %139 = vector.multi_reduction <maximumf>, %138, %cst_44 [1] : vector<8x128xf32> to vector<8xf32>
    %140 = vector.shape_cast %139 : vector<8xf32> to vector<8x1xf32>
    %141 = vector.broadcast %140 : vector<8x1xf32> to vector<8x128xf32>
    %142 = arith.subf %138, %141 : vector<8x128xf32>
    %143 = math.exp %142 : vector<8x128xf32>
    %cst_45 = arith.constant dense<0.000000e+00> : vector<8xf32>
    %144 = vector.multi_reduction <add>, %143, %cst_45 [1] : vector<8x128xf32> to vector<8xf32>
    %145 = vector.shape_cast %144 : vector<8xf32> to vector<8x1xf32>
    %146 = vector.broadcast %145 : vector<8x1xf32> to vector<8x128xf32>
    %147 = arith.divf %143, %146 : vector<8x128xf32>
    %c0_46 = arith.constant 0 : index
    %c0_47 = arith.constant 0 : index
    %148 = vector.load %arg4[%c0_46, %c0_47] : memref<8x128xf32, #tpu.memory_space<vmem>>, vector<8x128xf32>
    tpu.vector_store %arg4[%c0_46, %c0_47], %147 {strides = array<i32>} : memref<8x128xf32, #tpu.memory_space<vmem>>, vector<8x128xf32>,
    return
  }
  func.func @transform_0(%arg0: i32) -> (i32, i32, i32) {
    %c0_i32 = arith.constant 0 : i32
    %c0_i32_0 = arith.constant 0 : i32
    %c0_i32_1 = arith.constant 0 : i32
    return %c0_i32, %arg0, %c0_i32_0 : i32, i32, i32
  }
  func.func @transform_1(%arg0: i32) -> (i32, i32) {
    %c0_i32 = arith.constant 0 : i32
    %c0_i32_0 = arith.constant 0 : i32
    return %arg0, %c0_i32 : i32, i32
  }
  func.func @transform_2(%arg0: i32) -> (i32, i32) {
    %c0_i32 = arith.constant 0 : i32
    %c0_i32_0 = arith.constant 0 : i32
    %c0_i32_1 = arith.constant 0 : i32
    return %c0_i32, %c0_i32_0 : i32, i32
  }
  func.func @transform_3(%arg0: i32) -> (i32, i32) {
    %c0_i32 = arith.constant 0 : i32
    %c0_i32_0 = arith.constant 0 : i32
    return %arg0, %c0_i32 : i32, i32
  }
}

</mosaic_0001>

<bundles_post_ra>
// kernel: tpu_custom_call.1
= control target key start
LH: loop header
LB: loop body
LE: loop exit
PB: predicated region body
PF: predicated region fallthrough
CT: control target
= control target key end

     0   :  { %8 = vsyncpa [#allocation3], 0  ;;  %s647_s0 = inlined_call_operand.hbm [shape: f32[3,8,32], index: 0, kind: input, shape index: {}]   ;;  %s648_s1 = inlined_call_operand.hbm [shape: f32[8,32], index: 1, kind: input, shape index: {}]   ;;  %s649_s2 = inlined_call_operand.hbm [shape: f32[272,128], index: 2, kind: input, shape index: {}]   ;;  %s650_s3 = inlined_call_operand.hbm [shape: f32[8,128], index: 3, kind: output, shape index: {}]  }
   0x1   :  { %9 = vsyncpa [#allocation6], 0  ;;  %s29_s14 = sshll.u32 %s648_s1, 4  ;;  %s30_s14 = int_to_ptr.hbm [resolvable:$true] %s29_s14 }
   0x2   :  { %10 = vsyncpa [#allocation4], 0  ;;  %s583_s15 = smov [#allocation5]   ;;  %s15_s19 = sshll.u32 %s647_s0, 4  ;;  %s16_s19 = int_to_ptr.hbm [resolvable:$true] %s15_s19 }
   0x3   :  { %s31_s16 = sshll.u32 %s583_s15, 4  ;;  %s584_s20 = smov [#allocation2]   ;;  %s32_s16 = int_to_ptr.vmem [resolvable:$true] %s31_s16 }
   0x4   :  { %34 = dma.hbm_to_vmem [thread:$0]  %s30_s14, 128, %s32_s16, [#allocation6]  }
   0x5   :  { %s17_s21 = sshll.u32 %s584_s20, 4  ;;  %s585_s22 = smov 128   ;;  %s18_s21 = int_to_ptr.vmem [resolvable:$true] %s17_s21 }
   0x6   :  { %s586_s23 = smov 8   ;;  %s39_s1 = sshll.u32 %s649_s2, 4  ;;  %s40_s1 = int_to_ptr.hbm [resolvable:$true] %s39_s1 }
   0x7   :  { %23 = dma.hbm_to_vmem [thread:$0]  %s16_s19, 384, %s18_s21, [#allocation3], %s585_s22, %s585_s22, %s586_s23  }
   0x8   :  { %s587_s26 = smov [#allocation7]  }
   0x9   :  { %s41_s27 = sshll.u32 %s587_s26, 4  ;;  %s42_s27 = int_to_ptr.vmem [resolvable:$true] %s41_s27 }
   0xa   :  { %47 = dma.hbm_to_vmem [thread:$0]  %s40_s1, 4352, %s42_s27, [#allocation6], %s585_s22, %s585_s22, %s586_s23  }
   0xb   :  { %577 = dma.done.wait [#allocation3], 384  }
   0xc   :  { %578 = vsyncadd [#allocation3], 4294966912 }
   0xd   :  { %579 = dma.done.wait [#allocation6], 4480  }
   0xe   :  { %580 = vsyncadd [#allocation6], 4294962816  ;;  %v121_v0 = vld [vmem:[#allocation2] sm:$0xff]  ;;  %v123_v1 = vld [vmem:[#allocation2 + $0x8] sm:$0xff]  ;;  %s588_s0 = smov 32   ;;  %vm133_vm0 = vcmask 261120  }
   0xf   :  { %v125_v2 = vld [vmem:[#allocation2 + $0x10] sm:$0xff]  ;;  %v126_v3 = vadd.f32 %v123_v1, %v121_v0  ;;  %v76_v5 = vld [vmem:[#allocation7 + $0x58] sm:$0xff]  ;;  %v73_v6 = vld [vmem:[#allocation7 + $0x40] sm:$0xff]  ;;  %v154_v20 = vpack.c.bf16 %v123_v1, %v121_v0  ;;  %vm137_vm1 = vcmask 523264   ;;  %s589_s2 = smov 96   ;;  %vm239_vm2 = vcmask 1041408  }
  0x10   :  { %v75_v4 = vld [vmem:[#allocation7 + $0x50] sm:$0xff]  ;;  %v74_v8 = vld [vmem:[#allocation7 + $0x48] sm:$0xff]  ;;  %v68_v10 = vld [vmem:[#allocation7 + $0x38] sm:$0xff]  ;;  %v155_v25 = vpack.c.bf16 %v125_v2, %v125_v2  ;;  %vm232_vm3 = vcmask 31744   ;;  %s591_s28 = smov [#allocation8]   ;;  %s424_s5 = sshll.u32 %s650_s3, 4  ;;  %s425_s5 = int_to_ptr.hbm [resolvable:$true] %s424_s5 }
  0x11   :  { %v78_v7 = vpack.c.bf16 %v76_v5, %v75_v4  ;;  %v67_v9 = vld [vmem:[#allocation7 + $0x30] sm:$0xff]  ;;  %v127_v11 = vadd.f32 %v126_v3, %v125_v2  ;;  %v65_v13 = vld [vmem:[#allocation7 + $0x20] sm:$0xff]  ;;  %v66_v14 = vld [vmem:[#allocation7 + $0x28] sm:$0xff]  ;;  %v77_v15 = vpack.c.bf16 %v74_v8, %v73_v6  ;;  %s422_s29 = sshll.u32 %s591_s28, 4  ;;  %s423_s29 = int_to_ptr.vmem [resolvable:$true] %s422_s29 }
  0x12   :  { %v72_v12 = vpack.c.bf16 %v68_v10, %v67_v9  ;;  %v63_v16 = vld [vmem:[#allocation7 + $0x10] sm:$0xff]  ;;  %v64_v17 = vld [vmem:[#allocation7 + $0x18] sm:$0xff]  ;;  %v71_v19 = vpack.c.bf16 %v66_v14, %v65_v13  ;;  %v61_v22 = vld [vmem:[#allocation7] sm:$0xff] }
  0x13   :  { %169 = vmatpush.bf16.msra.mxu1 %v78_v7  ;;  %v128_v18 = vmul.f32 0.33333334, %v127_v11  ;;  %v70_v21 = vpack.c.bf16 %v64_v17, %v63_v16  ;;  %v62_v23 = vld [vmem:[#allocation7 + $0x8] sm:$0xff]  ;;  %v623_v26 = vld [vmem:[#allocation5] sm:$0xff]  ;;  %v454_v30 = vld [vmem:[#allocation7 + $0x105] ss:$0 sm:$0xff] }
  0x14   :  { %145 = vmatpush.bf16.msra.mxu0 %v72_v12  ;;  %v69_v24 = vpack.c.bf16 %v62_v23, %v61_v22  ;;  %v105_v35 = vld [vmem:[#allocation7 + $0xf0] sm:$0xff]  ;;  %v106_v36 = vld [vmem:[#allocation7 + $0xf8] sm:$0xff]  ;;  %v103_v40 = vld [vmem:[#allocation7 + $0xe0] sm:$0xff] }
  0x15   :  { %130 = vrot.lane.b32.xlu0 %v128_v18, %s588_s0  ;;  %v108_v37 = vpack.c.bf16 %v106_v36, %v105_v35  ;;  %v104_v41 = vld [vmem:[#allocation7 + $0xe8] sm:$0xff]  ;;  %v455_v44 = vld [vmem:[#allocation7 + $0x104] ss:$0 sm:$0xff]  ;;  %v109_v54 = vld [vmem:[#allocation7 + $0x100] sm:$0xf] }
  0x16   :  { %v107_v42 = vpack.c.bf16 %v104_v41, %v103_v40  ;;  %v110_v55 = vpack.c.bf16 %v109_v54, %v109_v54 }
  0x17   :  { %170 = vmatpush.bf16.msra.mxu1 %v77_v15  ;;  %198 = vmatpush.bf16.msra.mxu2 %v108_v37 }
  0x18   :  { %146 = vmatpush.bf16.msra.mxu0 %v71_v19  ;;  %v241_v57 = vsel %vm239_vm2, %v110_v55, 0  ;;  %v90_v55 = vld [vmem:[#allocation7 + $0xa8] sm:$0xff] }
  0x19   :  { %250 = vmatpush.bf16.msra.mxu3 %v241_v57 }
  0x1a   :  { %436 = vmatmul.msk.bf16.vlgmr.msra.gmra.mxu1 %vm133_vm0, %v154_v20 }
  0x1b   :  { %199 = vmatpush.bf16.msra.mxu2 %v107_v42 }
  0x1c   :  { %147 = vmatpush.bf16.msra.mxu0 %v70_v21 }
  0x20   :  { %148 = vmatpush.bf16.msra.mxu0 %v69_v24 }
  0x2a   :  { %437 = vmatmul.msk.bf16.gmra.mxu1 %vm133_vm0, %v155_v25 }
  0x87   :  { %v131_v27 = vpop.permute.xlu0 %130 }
  0x88   :  { %v134_v28 = vsel %vm133_vm0, %v623_v26, %v131_v27 }
  0x89   :  { %v135_v29 = vpack.c.bf16 %v134_v28, %v134_v28 }
  0x8b   :  { %435 = vmatmul.msk.bf16.vlgmr.msra.gmra.mxu0 %vm137_vm1, %v135_v29 }
  0x97   :  { %v172_v31 = vpop.f32.mrf.mxu1 }
  0x98   :  { %v173_v32 = vadd.f32 %v454_v30, %v172_v31 }
  0x9a   :  { %264 = vrot.lane.b32.xlu0 %v173_v32, %s589_s2 }
  0x9f   :  { %v174_v33 = vpop.f32.mrf.mxu1 }
  0xa0   :  { %v175_v34 = vadd.f32 %v454_v30, %v174_v33  ;;  %v590_v33 = vmov 32.0  }
  0xa2   :  { %266 = vrot.lane.b32.xlu1 %v175_v34, %s589_s2 }
  0xa7   :  { %v177_v38 = vpop.f32.mrf.mxu1 }
  0xa8   :  { %v178_v39 = vadd.f32 %v454_v30, %v177_v38 }
  0xaa   :  { %268 = vrot.lane.b32.xlu1 %v178_v39, %s589_s2 }
  0xaf   :  { %v179_v43 = vpop.f32.mrf.mxu1 }
 0x108   :  { %v150_v45 = vpop.f32.mrf.mxu0 }
 0x109   :  { %v151_v46 = vadd.f32 %v455_v44, %v150_v45  ;;  %v81_v44 = vld [vmem:[#allocation7 + $0x70] sm:$0xff]  ;;  %v82_v45 = vld [vmem:[#allocation7 + $0x78] sm:$0xff] }
 0x10b   :  { %v181_v47 = vmul.f32 %v173_v32, %v151_v46  ;;  %v182_v48 = vmul.f32 %v175_v34, %v151_v46  ;;  %v183_v51 = vmul.f32 %v178_v39, %v151_v46  ;;  %v84_v46 = vpack.c.bf16 %v82_v45, %v81_v44 }
 0x10c   :  { %v265_v22 = vpop.permute.xlu0 %264 }
 0x10d   :  { %v184_v49 = vpack.c.bf16 %v182_v48, %v181_v47  ;;  %v185_v52 = vpack.c.bf16 %v183_v51, %v183_v51  ;;  %v79_v47 = vld [vmem:[#allocation7 + $0x60] sm:$0xff]  ;;  %v80_v48 = vld [vmem:[#allocation7 + $0x68] sm:$0xff]  ;;  %323 = vmatpush.bf16.msrb.mxu0 %v84_v46  ;;  %v92_v51 = vld [vmem:[#allocation7 + $0xb8] sm:$0xff] }
 0x10f   :  { %438 = vmatmul.msk.bf16.vlgmr.msra.gmra.mxu2 %vm133_vm0, %v184_v49  ;;  %v83_v49 = vpack.c.bf16 %v80_v48, %v79_v47  ;;  %v460_v47 = vld [vmem:[#allocation7 + $0x10a] ss:$0 sm:$0xff] }
 0x110   :  { %v152_v50 = vpop.f32.mrf.mxu0 }
 0x111   :  { %324 = vmatpush.bf16.msrb.mxu0 %v83_v49  ;;  %v91_v50 = vld [vmem:[#allocation7 + $0xb0] sm:$0xff] }
 0x112   :  { %v96_v54 = vpack.c.bf16 %v92_v51, %v91_v50  ;;  %v461_v50 = vld [vmem:[#allocation7 + $0x10b] ss:$0 sm:$0xff] }
 0x114   :  { %v267_v19 = vpop.permute.xlu1 %266  ;;  %340 = vmatpush.bf16.msrb.mxu3 %v96_v54 }
 0x11c   :  { %v269_v24 = vpop.permute.xlu1 %268 }
 0x11f   :  { %439 = vmatmul.msk.bf16.gmra.mxu2 %vm133_vm0, %v185_v52  ;;  %v89_v52 = vld [vmem:[#allocation7 + $0xa0] sm:$0xff] }
 0x120   :  { %v95_v57 = vpack.c.bf16 %v90_v55, %v89_v52 }
 0x122   :  { %341 = vmatpush.bf16.msrb.mxu3 %v95_v57 }
 0x192   :  { %v201_v53 = vpop.f32.mrf.mxu2 }
 0x193   :  { %v210_v59 = vmul.f32 0.35355338, %v201_v53 }
 0x19a   :  { %v203_v56 = vpop.f32.mrf.mxu2 }
 0x19b   :  { %v211_v58 = vmul.f32 0.35355338, %v203_v56 }
 0x19d   :  { %v213_v61 = vmax.f32 %v210_v59, %v211_v58 }
 0x1a2   :  { %v206_v60 = vpop.f32.mrf.mxu2 }
 0x1a3   :  { %v212_v62 = vmul.f32 0.35355338, %v206_v60  ;;  %v88_v60 = vld [vmem:[#allocation7 + $0x98] sm:$0xff] }
 0x1a5   :  { %v214_v63 = vmax.f32 %v213_v61, %v212_v62 }
 0x1a7   :  { %v215_v0 = vsub.f32 %v210_v59, %v214_v63  ;;  %v218_v1 = vsub.f32 %v211_v58, %v214_v63  ;;  %v221_v2 = vsub.f32 %v212_v62, %v214_v63  ;;  %v87_v59 = vld [vmem:[#allocation7 + $0x90] sm:$0xff]  ;;  %v85_v62 = vld [vmem:[#allocation7 + $0x80] sm:$0xff]  ;;  %v86_v63 = vld [vmem:[#allocation7 + $0x88] sm:$0xff] }
 0x1a8   :  { %v94_v61 = vpack.c.bf16 %v88_v60, %v87_v59 }
 0x1a9   :  { %v216_v3 = vmul.f32 1.442695, %v215_v0  ;;  %v219_v4 = vmul.f32 1.442695, %v218_v1  ;;  %v222_v5 = vmul.f32 1.442695, %v221_v2  ;;  %v93_v0 = vpack.c.bf16 %v86_v63, %v85_v62 }
 0x1aa   :  { %v208_v6 = vpop.f32.mrf.mxu2  ;;  %342 = vmatpush.bf16.msrb.mxu3 %v94_v61 }
 0x1ab   :  { %463 = vpow2.f32 %v216_v3 }
 0x1ac   :  { %465 = vpow2.f32 %v219_v4 }
 0x1ad   :  { %467 = vpow2.f32 %v222_v5 }
 0x1ae   :  { %343 = vmatpush.bf16.msrb.mxu3 %v93_v0 }
 0x1b1   :  { %v464_v7 = vpop.eup %463 }
 0x1b2   :  { %v466_v8 = vpop.eup %465 }
 0x1b3   :  { %v224_v9 = vadd.f32 %v466_v8, %v464_v7  ;;  %v468_v10 = vpop.eup %467 }
 0x1b5   :  { %v225_v11 = vadd.f32 %v468_v10, %v224_v9 }
 0x1b7   :  { %469 = vrcp.f32 %v225_v11 }
 0x1b8   :  { %471 = vrcp.f32 %v590_v33 }
 0x1bd   :  { %v470_v12 = vpop.eup %469 }
 0x1be   :  { %v227_v13 = vmul.f32 %v470_v12, %v464_v7  ;;  %v228_v14 = vmul.f32 %v470_v12, %v466_v8  ;;  %v229_v16 = vmul.f32 %v470_v12, %v468_v10  ;;  %v472_v34 = vpop.eup %471  ;;  %v456_v7 = vld [vmem:[#allocation7 + $0x106] ss:$0 sm:$0xff]  ;;  %v457_v10 = vld [vmem:[#allocation7 + $0x107] ss:$0 sm:$0xff] }
 0x1bf   :  { %v283_v35 = vmul.f32 32.0, %v472_v34  ;;  %vm287_vm4 = vweird.f32 %v472_v34 }
 0x1c0   :  { %v230_v15 = vpack.c.bf16 %v228_v14, %v227_v13  ;;  %v231_v17 = vpack.c.bf16 %v229_v16, %v229_v16  ;;  %v458_v14 = vld [vmem:[#allocation7 + $0x108] ss:$0 sm:$0xff] }
 0x1c1   :  { %v284_v36 = vsub.f32 1.0, %v283_v35  ;;  %v97_v35 = vld [vmem:[#allocation7 + $0xc0] sm:$0xff] }
 0x1c2   :  { %440 = vmatmul.msk.bf16.vlgmr.msra.gmra.mxu3 %vm232_vm3, %v230_v15 }
 0x1c3   :  { %v285_v37 = vmul.f32 %v472_v34, %v284_v36  ;;  %v98_v36 = vld [vmem:[#allocation7 + $0xc8] sm:$0xff] }
 0x1c5   :  { %v286_v38 = vadd.f32 %v472_v34, %v285_v37  ;;  %v101_v37 = vpack.c.bf16 %v98_v36, %v97_v35 }
 0x1c7   :  { %v632_v39 = vsel %vm287_vm4, %v472_v34, %v286_v38 }
 0x1d2   :  { %441 = vmatmul.msk.bf16.gmra.mxu3 %vm232_vm3, %v231_v17 }
 0x245   :  { %v252_v18 = vpop.f32.mrf.mxu3 }
 0x246   :  { %v273_v23 = vmul.f32 %v265_v22, %v252_v18 }
 0x24d   :  { %v254_v20 = vpop.f32.mrf.mxu3 }
 0x24e   :  { %v274_v21 = vmul.f32 %v267_v19, %v254_v20  ;;  %v459_v20 = vld [vmem:[#allocation7 + $0x109] ss:$0 sm:$0xff] }
 0x250   :  { %v276_v27 = vadd.f32 %v274_v21, %v273_v23 }
 0x255   :  { %v257_v25 = vpop.f32.mrf.mxu3 }
 0x256   :  { %v275_v28 = vmul.f32 %v269_v24, %v257_v25 }
 0x258   :  { %v277_v29 = vadd.f32 %v276_v27, %v275_v28  ;;  %v99_v27 = vld [vmem:[#allocation7 + $0xd0] sm:$0xff]  ;;  %v100_v28 = vld [vmem:[#allocation7 + $0xd8] sm:$0xff] }
 0x25a   :  { %v278_v30 = vadd.f32 %v277_v29, %v623_v26  ;;  %v102_v29 = vpack.c.bf16 %v100_v28, %v99_v27 }
 0x25c   :  { %v279_v31 = vsel %vm133_vm0, %v278_v30, 0.0  ;;  %387 = vmatpush.bf16.msrb.mxu1 %v102_v29 }
 0x25d   :  { %280 = vadd.xlane.f32.xlu2 %v279_v31  ;;  %v259_v32 = vpop.f32.mrf.mxu3 }
 0x260   :  { %388 = vmatpush.bf16.msrb.mxu1 %v101_v37 }
 0x2d0   :  { %v281_v40 = vpop.xlane.xlu2 %280 }
 0x2d1   :  { %v289_v41 = vmul.f32 %v632_v39, %v281_v40 }
 0x2d3   :  { %v290_v42 = vsub.f32 %v278_v30, %v289_v41 }
 0x2d5   :  { %v291_v43 = vmul.f32 %v290_v42, %v290_v42 }
 0x2d7   :  { %v292_v26 = vsel %vm133_vm0, %v291_v43, 0.0 }
 0x2d8   :  { %293 = vadd.xlane.f32.xlu2 %v292_v26 }
 0x34b   :  { %v294_v53 = vpop.xlane.xlu2 %293 }
 0x34c   :  { %v295_v56 = vmul.f32 %v294_v53, %v632_v39 }
 0x34e   :  { %v296_v58 = vadd.f32 1e-05, %v295_v56 }
 0x350   :  { %473 = vrsqrt.f32 %v296_v58  ;;  %vm303_vm6 = vweird.f32 %v296_v58 }
 0x356   :  { %v474_v1 = vpop.eup %473 }
 0x357   :  { %v298_v2 = vmul.f32 %v474_v1, %v296_v58  ;;  %vm304_vm5 = vweird.f32 %v474_v1 }
 0x358   :  { %vm305_vm7 = vmor %vm303_vm6, %vm304_vm5 }
 0x359   :  { %v299_v3 = vmul.f32 %v474_v1, %v298_v2 }
 0x35b   :  { %v300_v4 = vmul.f32 0.5, %v299_v3 }
 0x35d   :  { %v301_v5 = vsub.f32 1.5, %v300_v4 }
 0x35f   :  { %v302_v6 = vmul.f32 %v474_v1, %v301_v5 }
 0x361   :  { %v306_v8 = vsel %vm305_vm7, %v474_v1, %v302_v6 }
 0x362   :  { %v307_v9 = vmul.f32 %v306_v8, %v290_v42 }
 0x364   :  { %v309_v11 = vmul.f32 %v456_v7, %v307_v9 }
 0x366   :  { %v311_v12 = vadd.f32 %v457_v10, %v309_v11 }
 0x368   :  { %v312_v13 = vpack.c.bf16 %v311_v12, %v311_v12 }
 0x36a   :  { %442 = vmatmul.msk.bf16.vlgmr.msrb.gmra.mxu0 %vm133_vm0, %v312_v13 }
 0x3e7   :  { %v326_v15 = vpop.f32.mrf.mxu0 }
 0x3e8   :  { %v327_v16 = vadd.f32 %v458_v14, %v326_v15 }
 0x3ea   :  { %v330_v17 = vmax.f32 %v327_v16, 0.0 }
 0x3ec   :  { %v331_v18 = vpack.c.bf16 %v330_v17, %v330_v17 }
 0x3ee   :  { %443 = vmatmul.msk.bf16.vlgmr.msrb.gmra.mxu3 %vm137_vm1, %v331_v18 }
 0x3ef   :  { %v328_v19 = vpop.f32.mrf.mxu0 }
 0x471   :  { %v345_v21 = vpop.f32.mrf.mxu3 }
 0x472   :  { %v346_v22 = vadd.f32 %v459_v20, %v345_v21 }
 0x474   :  { %v349_v23 = vadd.f32 %v346_v22, %v311_v12 }
 0x476   :  { %v350_v24 = vsel %vm133_vm0, %v349_v23, 0.0 }
 0x477   :  { %351 = vadd.xlane.f32.xlu0 %v350_v24 }
 0x479   :  { %v347_v25 = vpop.f32.mrf.mxu3 }
 0x4ea   :  { %v352_v30 = vpop.xlane.xlu0 %351 }
 0x4eb   :  { %v353_v31 = vmul.f32 %v352_v30, %v632_v39 }
 0x4ed   :  { %v354_v32 = vsub.f32 %v349_v23, %v353_v31 }
 0x4ef   :  { %v355_v33 = vmul.f32 %v354_v32, %v354_v32 }
 0x4f1   :  { %v356_v34 = vsel %vm133_vm0, %v355_v33, 0.0 }
 0x4f2   :  { %357 = vadd.xlane.f32.xlu1 %v356_v34 }
 0x565   :  { %v358_v38 = vpop.xlane.xlu1 %357 }
 0x566   :  { %v359_v40 = vmul.f32 %v358_v38, %v632_v39  ;;  %v462_v39 = vld [vmem:[#allocation7 + $0x10c] ss:$0 sm:$0xff] }
 0x568   :  { %v360_v41 = vadd.f32 1e-05, %v359_v40 }
 0x56a   :  { %475 = vrsqrt.f32 %v360_v41  ;;  %vm367_vm9 = vweird.f32 %v360_v41 }
 0x570   :  { %v476_v42 = vpop.eup %475 }
 0x571   :  { %v362_v43 = vmul.f32 %v476_v42, %v360_v41  ;;  %vm368_vm8 = vweird.f32 %v476_v42 }
 0x572   :  { %vm369_vm10 = vmor %vm367_vm9, %vm368_vm8 }
 0x573   :  { %v363_v26 = vmul.f32 %v476_v42, %v362_v43 }
 0x575   :  { %v364_v44 = vmul.f32 0.5, %v363_v26 }
 0x577   :  { %v365_v45 = vsub.f32 1.5, %v364_v44 }
 0x579   :  { %v366_v46 = vmul.f32 %v476_v42, %v365_v45 }
 0x57b   :  { %v370_v48 = vsel %vm369_vm10, %v476_v42, %v366_v46 }
 0x57c   :  { %v371_v49 = vmul.f32 %v370_v48, %v354_v32 }
 0x57e   :  { %v373_v51 = vmul.f32 %v460_v47, %v371_v49 }
 0x580   :  { %v375_v52 = vadd.f32 %v461_v50, %v373_v51 }
 0x582   :  { %v376_v53 = vpack.c.bf16 %v375_v52, %v375_v52 }
 0x584   :  { %444 = vmatmul.msk.bf16.vlgmr.msrb.gmra.mxu1 %vm133_vm0, %v376_v53 }
 0x601   :  { %v390_v54 = vpop.f32.mrf.mxu1 }
 0x602   :  { %v391_v55 = vadd.f32 %v462_v39, %v390_v54 }
 0x604   :  { %394 = vmax.xlane.f32.xlu2 %v391_v55 }
 0x609   :  { %v392_v56 = vpop.f32.mrf.mxu1 }
 0x677   :  { %v395_v57 = vpop.xlane.xlu2 %394 }
 0x678   :  { %v396_v58 = vsub.f32 %v391_v55, %v395_v57 }
 0x67a   :  { %v397_v59 = vmul.f32 1.442695, %v396_v58 }
 0x67c   :  { %477 = vpow2.f32 %v397_v59 }
 0x682   :  { %v478_v60 = vpop.eup %477 }
 0x683   :  { %399 = vadd.xlane.f32.xlu2 %v478_v60 }
 0x6f6   :  { %v400_v61 = vpop.xlane.xlu2 %399 }
 0x6f7   :  { %479 = vrcp.f32 %v400_v61  ;;  %v412_v1 = vand.u32 2147483648, %v400_v61  ;;  %v410_v3 = vand.u32 2147483647, %v400_v61  ;;  %vm406_vm12 = vweird.f32 %v400_v61 }
 0x6f9   :  { %v413_v5 = vor.u32 1.1754944e-38, %v412_v1  ;;  %vm411_vm14 = vcmp.eq.f32.partialorder %v410_v3, 8.507059e+37 }
 0x6fd   :  { %v480_v62 = vpop.eup %479 }
 0x6fe   :  { %v402_v63 = vmul.f32 %v480_v62, %v400_v61  ;;  %vm407_vm11 = vweird.f32 %v480_v62 }
 0x6ff   :  { %vm408_vm13 = vmor %vm406_vm12, %vm407_vm11 }
 0x700   :  { %v403_v0 = vsub.f32 1.0, %v402_v63 }
 0x702   :  { %v404_v2 = vmul.f32 %v480_v62, %v403_v0 }
 0x704   :  { %v405_v4 = vadd.f32 %v480_v62, %v404_v2 }
 0x706   :  { %v409_v6 = vsel %vm408_vm13, %v480_v62, %v405_v4 }
 0x707   :  { %v414_v7 = vsel %vm411_vm14, %v413_v5, %v409_v6 }
 0x708   :  { %v415_v8 = vmul.f32 %v478_v60, %v414_v7 }
 0x70a   :  { %416 = vst [vmem:[#allocation8] sm:$0xff] %v415_v8 }
 0x70b   :  { %427 = dma.vmem_to_hbm [thread:$0]  %s423_s29, 128, %s425_s5, [#allocation4]  }
 0x70c   :  { %581 = dma.done.wait [#allocation4], 128  }
 0x70d   :  { %582 = vsyncadd [#allocation4], 4294967168 }
 0x70e   :  { %432 = vsyncpa [#allocation3], 1 }
 0x70f   :  { %433 = vsyncpa [#allocation6], 1 }
 0x710   :  { %434 = vsyncpa [#allocation4], 1 }

</bundles_post_ra>
